<compile_context>
chip_gen: v5e
topology: v5e:2x2
jax: 0.10.0
libtpu: 0.0.40
codegen_flags: <defaults>
</compile_context>

<pallas_src>
import functools
import math

import jax
import jax.numpy as jnp
from jax.experimental import pallas as pl
from jax.experimental.pallas import tpu as pltpu

_LANE = 128      # lane width — last dim alignment
_SUBLANE = 8     # f32 sublane — second-to-last dim alignment


def _round_up(x: int, m: int) -> int:
    return ((x + m - 1) // m) * m


def _fused_mlp_kernel(x_ref, w_ref, b_ref, o_ref, *, n_layers: int,
                      activation: str, compute_dtype):
    """One (tm, Dp) batch tile through all layers; intermediates stay on-chip.

    x_ref: (tm, Dp)        activations tile (padded features, compute_dtype)
    w_ref: (L, Dp, Dp)     all weights, zero-padded, VMEM resident
    b_ref: (L, 1, Dp)      all biases, zero-padded, f32, VMEM resident
    o_ref: (tm, Dp)        padded output tile (f32)
    """
    y = x_ref[...]                                  # compute_dtype
    for l in range(n_layers):                       # static unroll — L is tiny
        w = w_ref[l]                                # (Dp, Dp), compute_dtype
        b = b_ref[l]                                # (1, Dp), f32
        # MXU matmul: inputs in compute_dtype (bf16 on v6e/v7x), f32 accumulate.
        y = jnp.dot(y.astype(compute_dtype), w,
                    preferred_element_type=jnp.float32)
        y = y + b                                   # f32 epilogue on the VPU
        if activation == "relu":
            y = jnp.maximum(y, 0.0)
        elif activation == "identity":
            pass
        else:
            raise ValueError(f"unsupported activation: {activation}")
    o_ref[...] = y.astype(o_ref.dtype)


def mlp_forward_fused(x, params, *, activation: str = "identity",
                      tm: int = 128, compute_dtype=jnp.float32):
    """Fused MLP forward: y = act(Linear_i(y)) for each layer, one pallas_call."""
    batch, d_in = x.shape
    dims = [d_in] + [w.shape[1] for (w, _) in params]
    n_layers = len(params)

    # Uniform padded feature width (lane-dense, >= every layer's in/out dim).
    dp = max(_round_up(d, _LANE) for d in dims)

    # Zero-pad + stack weights/biases once outside the kernel. Zero padding is
    # exact: padded input columns hit zero weight rows, padded output columns
    # get zero bias and feed zero weight rows of the next layer.
    w_stack = jnp.stack([
        jnp.pad(w.astype(compute_dtype),
                ((0, dp - w.shape[0]), (0, dp - w.shape[1])))
        for (w, _) in params])                                    # (L, Dp, Dp)
    b_stack = jnp.stack([
        jnp.pad(b.astype(jnp.float32), (0, dp - b.shape[0])).reshape(1, dp)
        for (_, b) in params])                                    # (L, 1, Dp)

    # Pad batch to a multiple of the batch tile.
    tm = max(_SUBLANE, tm)
    mp = _round_up(batch, tm)
    xp = jnp.zeros((mp, dp), compute_dtype)
    xp = xp.at[:batch, :d_in].set(x.astype(compute_dtype))

    kernel = functools.partial(_fused_mlp_kernel, n_layers=n_layers,
                               activation=activation,
                               compute_dtype=compute_dtype)

    flops = 2 * mp * dp * dp * n_layers
    bytes_accessed = (xp.size * xp.dtype.itemsize
                      + w_stack.size * w_stack.dtype.itemsize
                      + b_stack.size * b_stack.dtype.itemsize
                      + mp * dp * 4)

    out_padded = pl.pallas_call(
        kernel,
        out_shape=jax.ShapeDtypeStruct((mp, dp), jnp.float32),
        grid_spec=pltpu.PrefetchScalarGridSpec(
            num_scalar_prefetch=0,
            grid=(mp // tm,),                                     # batch tiles only
            in_specs=[
                pl.BlockSpec((tm, dp), lambda i: (i, 0)),             # activations
                pl.BlockSpec((n_layers, dp, dp), lambda i: (0, 0, 0)),  # all W
                pl.BlockSpec((n_layers, 1, dp), lambda i: (0, 0, 0)),   # all b
            ],
            out_specs=pl.BlockSpec((tm, dp), lambda i: (i, 0)),
        ),
        compiler_params=pltpu.CompilerParams(
            dimension_semantics=("parallel",)),                   # megacore on v7x
        cost_estimate=pl.CostEstimate(flops=flops, transcendentals=0,
                                      bytes_accessed=bytes_accessed),
    )(xp, w_stack, b_stack)

    return out_padded[:batch, :dims[-1]]


def init_mlp_params(key, dims):
    """Deterministic init matching nn.Linear's U(-1/sqrt(fan_in), 1/sqrt(fan_in))."""
    params = []
    for i in range(1, len(dims)):
        d_in, d_out = dims[i - 1], dims[i]
        key, kw, kb = jax.random.split(key, 3)
        bound = 1.0 / math.sqrt(d_in)
        w = jax.random.uniform(kw, (d_in, d_out), jnp.float32, -bound, bound)
        b = jax.random.uniform(kb, (d_out,), jnp.float32, -bound, bound)
        params.append((w, b))
    return params


def mlp_reference(x, params, *, activation: str = "identity"):
    y = x
    for (w, b) in params:
        y = y @ w + b
        if activation == "relu":
            y = jnp.maximum(y, 0.0)
    return y


if __name__ == "__main__":
    # MLP dims [32, 64, 48, 16]; batch 256 so tm=128 gives a 2-step parallel
    # grid (both v7x TensorCores busy; neutral on v5e/v6e single-TC chips).
    dims = [32, 64, 48, 16]
    batch = 256

    key = jax.random.PRNGKey(0)
    key, kx = jax.random.split(key)
    x = jax.random.normal(kx, (batch, dims[0]), jnp.float32)
    params = init_mlp_params(key, dims)

    ref = mlp_reference(x, params, activation="identity")

    # f32 MXU-input path (faithful to the PyTorch default f32 behaviour).
    out = mlp_forward_fused(x, params, activation="identity",
                            tm=128, compute_dtype=jnp.float32)
    out = jax.block_until_ready(out)
    assert out.shape == (batch, dims[-1])
    assert jnp.allclose(out, ref, atol=1e-5, rtol=1e-5), "f32 mismatch vs reference"

    # bf16 MXU-input / f32-accumulate path (v6e/v7x fast path) — checked at a
    # tolerance appropriate for bf16 inputs.
    out_bf16 = mlp_forward_fused(x, params, activation="identity",
                                 tm=128, compute_dtype=jnp.bfloat16)
    out_bf16 = jax.block_until_ready(out_bf16)
    assert out_bf16.shape == (batch, dims[-1])
    assert jnp.allclose(out_bf16, ref, atol=1e-1, rtol=1e-1), "bf16 mismatch vs reference"

    print("KERNEL_OK")
</pallas_src>

<mosaic_0001>
module attributes {stable_mosaic.version = 11 : i64} {
  func.func @_fused_mlp_kernel(%arg0: i32, %arg1: memref<128x128xf32, #tpu.memory_space<vmem>>, %arg2: memref<3x128x128xf32, #tpu.memory_space<vmem>>, %arg3: memref<3x1x128xf32, #tpu.memory_space<vmem>>, %arg4: memref<128x128xf32, #tpu.memory_space<vmem>>) attributes {dimension_semantics = [#tpu.dimension_semantics<parallel>], iteration_bounds = array<i64: 2>, scalar_prefetch = 0 : i64, scratch_operands = 0 : i64, tpu.core_type = #tpu.core_type<tc>, window_params = [{transform_indices = @transform_0, window_bounds = array<i64: 128, 128>}, {pipeline_mode = #tpu.pipeline_mode<synchronous>, transform_indices = @transform_1, window_bounds = array<i64: 3, 128, 128>}, {pipeline_mode = #tpu.pipeline_mode<synchronous>, transform_indices = @transform_2, window_bounds = array<i64: 3, 1, 128>}, {transform_indices = @transform_3, window_bounds = array<i64: 128, 128>}]} {
    %c0 = arith.constant 0 : index
    %c0_0 = arith.constant 0 : index
    %0 = vector.load %arg1[%c0, %c0_0] : memref<128x128xf32, #tpu.memory_space<vmem>>, vector<128x128xf32>
    %c0_1 = arith.constant 0 : index
    %c0_2 = arith.constant 0 : index
    %c0_3 = arith.constant 0 : index
    %1 = vector.load %arg2[%c0_1, %c0_2, %c0_3] : memref<3x128x128xf32, #tpu.memory_space<vmem>>, vector<1x128x128xf32>
    %2 = vector.shape_cast %1 : vector<1x128x128xf32> to vector<128x128xf32>
    %c0_4 = arith.constant 0 : index
    %c0_5 = arith.constant 0 : index
    %c0_6 = arith.constant 0 : index
    %3 = vector.load %arg3[%c0_4, %c0_5, %c0_6] : memref<3x1x128xf32, #tpu.memory_space<vmem>>, vector<1x1x128xf32>
    %4 = vector.shape_cast %3 : vector<1x1x128xf32> to vector<1x128xf32>
    %cst = arith.constant dense<0.000000e+00> : vector<128x128xf32>
    %5 = tpu.matmul %0, %2, %cst {dimension_numbers = #tpu.dot_dimension_numbers<[1], [0], [0], [1], [0, 0, 1, 1], [], []>} : vector<128x128xf32>, vector<128x128xf32>, vector<128x128xf32> -> vector<128x128xf32>
    %6 = vector.broadcast %4 : vector<1x128xf32> to vector<128x128xf32>
    %7 = arith.addf %5, %6 : vector<128x128xf32>
    %c1 = arith.constant 1 : index
    %c0_7 = arith.constant 0 : index
    %c0_8 = arith.constant 0 : index
    %8 = vector.load %arg2[%c1, %c0_7, %c0_8] : memref<3x128x128xf32, #tpu.memory_space<vmem>>, vector<1x128x128xf32>
    %9 = vector.shape_cast %8 : vector<1x128x128xf32> to vector<128x128xf32>
    %c1_9 = arith.constant 1 : index
    %c0_10 = arith.constant 0 : index
    %c0_11 = arith.constant 0 : index
    %10 = vector.load %arg3[%c1_9, %c0_10, %c0_11] : memref<3x1x128xf32, #tpu.memory_space<vmem>>, vector<1x1x128xf32>
    %11 = vector.shape_cast %10 : vector<1x1x128xf32> to vector<1x128xf32>
    %cst_12 = arith.constant dense<0.000000e+00> : vector<128x128xf32>
    %12 = tpu.matmul %7, %9, %cst_12 {dimension_numbers = #tpu.dot_dimension_numbers<[1], [0], [0], [1], [0, 0, 1, 1], [], []>} : vector<128x128xf32>, vector<128x128xf32>, vector<128x128xf32> -> vector<128x128xf32>
    %13 = vector.broadcast %11 : vector<1x128xf32> to vector<128x128xf32>
    %14 = arith.addf %12, %13 : vector<128x128xf32>
    %c2 = arith.constant 2 : index
    %c0_13 = arith.constant 0 : index
    %c0_14 = arith.constant 0 : index
    %15 = vector.load %arg2[%c2, %c0_13, %c0_14] : memref<3x128x128xf32, #tpu.memory_space<vmem>>, vector<1x128x128xf32>
    %16 = vector.shape_cast %15 : vector<1x128x128xf32> to vector<128x128xf32>
    %c2_15 = arith.constant 2 : index
    %c0_16 = arith.constant 0 : index
    %c0_17 = arith.constant 0 : index
    %17 = vector.load %arg3[%c2_15, %c0_16, %c0_17] : memref<3x1x128xf32, #tpu.memory_space<vmem>>, vector<1x1x128xf32>
    %18 = vector.shape_cast %17 : vector<1x1x128xf32> to vector<1x128xf32>
    %cst_18 = arith.constant dense<0.000000e+00> : vector<128x128xf32>
    %19 = tpu.matmul %14, %16, %cst_18 {dimension_numbers = #tpu.dot_dimension_numbers<[1], [0], [0], [1], [0, 0, 1, 1], [], []>} : vector<128x128xf32>, vector<128x128xf32>, vector<128x128xf32> -> vector<128x128xf32>
    %20 = vector.broadcast %18 : vector<1x128xf32> to vector<128x128xf32>
    %21 = arith.addf %19, %20 : vector<128x128xf32>
    %c0_19 = arith.constant 0 : index
    %c0_20 = arith.constant 0 : index
    %22 = vector.load %arg4[%c0_19, %c0_20] : memref<128x128xf32, #tpu.memory_space<vmem>>, vector<128x128xf32>
    tpu.vector_store %arg4[%c0_19, %c0_20], %21 {strides = array<i32>} : memref<128x128xf32, #tpu.memory_space<vmem>>, vector<128x128xf32>,
    return
  }
  func.func @transform_0(%arg0: i32) -> (i32, i32) {
    %c0_i32 = arith.constant 0 : i32
    %c0_i32_0 = arith.constant 0 : i32
    return %arg0, %c0_i32 : i32, i32
  }
  func.func @transform_1(%arg0: i32) -> (i32, i32, i32) {
    %c0_i32 = arith.constant 0 : i32
    %c0_i32_0 = arith.constant 0 : i32
    %c0_i32_1 = arith.constant 0 : i32
    %c0_i32_2 = arith.constant 0 : i32
    return %c0_i32, %c0_i32_0, %c0_i32_1 : i32, i32, i32
  }
  func.func @transform_2(%arg0: i32) -> (i32, i32, i32) {
    %c0_i32 = arith.constant 0 : i32
    %c0_i32_0 = arith.constant 0 : i32
    %c0_i32_1 = arith.constant 0 : i32
    %c0_i32_2 = arith.constant 0 : i32
    return %c0_i32, %c0_i32_0, %c0_i32_1 : i32, i32, i32
  }
  func.func @transform_3(%arg0: i32) -> (i32, i32) {
    %c0_i32 = arith.constant 0 : i32
    %c0_i32_0 = arith.constant 0 : i32
    return %arg0, %c0_i32 : i32, i32
  }
}

</mosaic_0001>

<bundles_post_ra>
// kernel: tpu_custom_call.1
= control target key start
LH: loop header
LB: loop body
LE: loop exit
PB: predicated region body
PF: predicated region fallthrough
CT: control target
= control target key end

     0   :  { %8 = vsyncpa [#allocation3], 0  ;;  %s1165_s0 = inlined_call_operand.hbm [shape: f32[256,128], index: 0, kind: input, shape index: {}]   ;;  %s1166_s1 = inlined_call_operand.hbm [shape: f32[3,128,128], index: 1, kind: input, shape index: {}]   ;;  %s1167_s2 = inlined_call_operand.hbm [shape: f32[3,1,128], index: 2, kind: input, shape index: {}]   ;;  %s1168_s3 = inlined_call_operand.hbm [shape: f32[256,128], index: 3, kind: output, shape index: {}]  }
   0x1   :  { %10 = vsyncpa [#allocation3 + $0x1], 0 }
   0x2   :  { %11 = vsyncpa [#allocation6], 0 }
   0x3   :  { %12 = vsyncpa [#allocation4], 0 }
   0x4   :  { %14 = vsyncpa [#allocation4 + $0x1], 0  ;;  %s959_s12 = smov 0   ;;  %s961_s13 = smov 0  }
   0x5   :  { %s963_s14 = smov 0   ;;  %s965_s15 = smov 0  }
   0x6 LB: > { %s980_s16 = sadd.s32 4294967295, %s929_s15   ;;  %s625_s17 = sadd.s32 4294967294, %s929_s15   ;;  %s929_s15 = sphi %s965_s15, %s1178_s15   ;;  %s925_s14 = sphi %s963_s14, %s1177_s14   ;;  %s921_s13 = sphi %s961_s13, %s1176_s13   ;;  %s917_s12 = sphi %s959_s12, %s1175_s12  }
   0x7   : > { %p40_p0 = scmp.ne.s32.totalorder %s921_s13, %s917_s12  ;;  %p41_p1 = scmp.eq.s32.totalorder %s980_s16, 0 }
   0x8   : > { %p106_p2 = scmp.eq.s32.totalorder %s980_s16, 1  ;;  %p112_p3 = scmp.eq.s32.totalorder %s625_s17, 1 }
   0x9   : > { %p989_p4 = por %p41_p1, %p40_p0  ;;  %p626_p5 = scmp.ge.s32.totalorder %s929_s15, 1 }
   0xa   : > { %p994_p6 = por %p112_p3, %p40_p0  ;;  %p119_p7 = scmp.lt.s32.totalorder %s929_s15, 3 }
   0xb   : > { %s130_s22 = sshll.u32 %s1166_s1, 4  ;;  %s931_s24 = smov [#allocation5]   ;;  %s131_s22 = int_to_ptr.hbm [resolvable:$true] %s130_s22 }
   0xc   : > { %p1002_p8 = pnand %p626_p5, %p119_p7  ;;  %s132_s25 = sshll.u32 %s931_s24, 4  ;;  %s133_s25 = int_to_ptr.vmem [resolvable:$true] %s132_s25 }
   0xd   : > { %s144_s28 = sshll.u32 %s1167_s2, 4  ;;  %s932_s29 = smov 128   ;;  %s145_s28 = int_to_ptr.hbm [resolvable:$true] %s144_s28 }
   0xe   : > { %p705_p9 = pneg %p1002_p8  ;;  %s933_s30 = smov 8  }
   0xf   : > { %s934_s4 = smov [#allocation7]   ;;  %s935_s6 = smov 16  }
  0x10   : > { %p706_p10 = pnand %p705_p9, %p41_p1  ;;  %s146_s5 = sshll.u32 %s934_s4, 4  ;;  %s147_s5 = int_to_ptr.vmem [resolvable:$true] %s146_s5 }
  0x11   : > { %s936_s7 = smov 1   ;;  %s1018_s8 = sadd.s32 1, %s929_s15  }
  0x12   : > { %708 = dma.hbm_to_vmem [thread:$0]  (!%p706_p10), %s131_s22, 6144, %s133_s25, [#allocation6], %s932_s29, %s932_s29, %s933_s30  }
  0x13   : > { %711 = dma.hbm_to_vmem [thread:$0]  (!%p706_p10), %s145_s28, 48, %s147_s5, [#allocation6], %s935_s6, %s935_s6, %s936_s7  }
  0x14   : > { %s24_s9 = ssub.s32 %s929_s15, %s1018_s8  ;;  %s27_s10 = sadd.s32 1, %s925_s14 }
  0x15   : > { %p25_p12 = scmp.eq.s32.totalorder %s24_s9, 0  ;;  %p34_p13 = scmp.ne.s32.totalorder %s925_s14, %s921_s13 }
  0x16   : > { %p35_p0 = scmp.eq.s32.totalorder %s929_s15, 0  ;;  %p722_p7 = scmp.lt.s32.totalorder %s929_s15, 2 }
  0x17   : > { %s1027_s11 = scalar_select %p25_p12, %s925_s14, %s27_s10  }
  0x18   : > { %p36_p3 = por %p35_p0, %p34_p13  ;;  %p1031_p5 = por %p106_p2, %p34_p13 }
  0x19   : > { %s160_s20 = sand.u32 1, %s925_s14   ;;  %s643_s22 = sshll.u32 %s929_s15, 7 }
  0x1a   : > { %s630_s21 = sshll.u32 %s160_s20, 7  ;;  %s169_s26 = scalar_lea.hbm %s1165_s0, %s643_s22 }
  0x1b   : > { %s164_s27 = scalar_lea.vmem [#allocation2], %s630_s21  ;;  %s170_s4 = sshll.u32 %s169_s26, 4  ;;  %s171_s4 = int_to_ptr.hbm [resolvable:$true] %s170_s4 }
  0x1c   : > { %s172_s28 = sshll.u32 %s164_s27, 4  ;;  %p1041_p9 = pnand %p722_p7, %p36_p3  ;;  %s173_s28 = int_to_ptr.vmem [resolvable:$true] %s172_s28 }
  0x1d   : > { %s161_s6 = scalar_lea.sflag [#allocation3], %s160_s20  ;;  %s829_s7 = sshra.s32 %s171_s4, 4  ;;  %s830_s7 = int_to_ptr.hbm [resolvable:$true] %s829_s7 }
  0x1e   : > { %s831_s9 = scalar_lea.hbm %s830_s7, 128  ;;  %p833_p10 = pneg %p1041_p9 }
  0x1f   : > { %p832_p2 = scmp.ne.s32.totalorder %s830_s7, %s831_s9  ;;  %s836_s22 = scalar_lea.hbm %s1165_s0, 256 }
  0x20   : > { %p837_p0 = scmp.lt.s32.totalorder %s830_s7, %s1165_s0  ;;  %p838_p3 = scmp.lt.s32.totalorder %s836_s22, %s831_s9 }
  0x21   : > { %p834_p12 = pnand %p833_p10, %p832_p2 }
  0x22   : > { %p839_p7 = por %p838_p3, %p837_p0 }
  0x23   : > { %p835_p13 = pneg %p834_p12 }
  0x25   : > { %p840_p11 = pnand %p839_p7, %p835_p13 }
  0x27   : > { %843 = shalt.err (!%p840_p11)
}
  0x28   : > { %715 = dma.hbm_to_vmem [thread:$0]  (!%p1041_p9), %s171_s4, 2048, %s173_s28, %s161_s6, %s932_s29, %s932_s29, %s933_s30  }
  0x29   : > { %184 = sbr.rel (%p1002_p8) target bundleno = 563 (0x233), region = 32  ;;  %s1061_s20 = sand.u32 (!%p1002_p8), 1, %s921_s13  }
  0x2a   : > { %s634_s26 = sshll.u32 (!%p1002_p8), %s1061_s20, 7  ;;  %s187_s27 = scalar_lea.sflag (!%p1002_p8), [#allocation3], %s1061_s20 }
  0x2b   : > { %s1067_s7 = scalar_lea.vmem (!%p1002_p8), [#allocation2], %s634_s26 }
  0x2e   : > { %904 = dma.done.wait (%p989_p4), %s187_s27, 2048  }
  0x2f   : > { %906 = vsyncadd (%p989_p4), %s187_s27, 4294965248 }
  0x30   : > { %908 = dma.done.wait (%p41_p1), [#allocation6], 6192  }
  0x31   : > { %910 = vsyncadd (%p41_p1), [#allocation6], 4294961104  ;;  %v257_v0 = vld [vmem:[#allocation5 + $0x78] sm:$0xff]  ;;  %v256_v1 = vld [vmem:[#allocation5 + $0x70] sm:$0xff]  ;;  %s1113_s18 = scalar_lea.vmem [#allocation8], %s634_s26  ;;  %s644_s23 = sshll.u32 %s980_s16, 7 }
  0x32   : > { %262 = vmatpush.msra.mxu0 %v257_v0  ;;  %645 = vmatpush.msra.mxu3 %v257_v0  ;;  %v255_v2 = vld [vmem:[#allocation5 + $0x68] sm:$0xff]  ;;  %v254_v3 = vld [vmem:[#allocation5 + $0x60] sm:$0xff]  ;;  %v253_v4 = vld [vmem:[#allocation5 + $0x58] sm:$0xff]  ;;  %s529_s28 = scalar_lea.hbm %s1168_s3, %s644_s23  ;;  %s530_s4 = sshll.u32 %s1113_s18, 4  ;;  %s531_s4 = int_to_ptr.vmem [resolvable:$true] %s530_s4 }
  0x33   : > { %v252_v5 = vld [vmem:[#allocation5 + $0x50] sm:$0xff]  ;;  %v251_v6 = vld [vmem:[#allocation5 + $0x48] sm:$0xff]  ;;  %v250_v7 = vld [vmem:[#allocation5 + $0x40] sm:$0xff]  ;;  %s532_s5 = sshll.u32 %s529_s28, 4  ;;  %s518_s6 = scalar_lea.sflag [#allocation4], %s1061_s20  ;;  %s533_s5 = int_to_ptr.hbm [resolvable:$true] %s532_s5 }
  0x34   : > { %263 = vmatpush.msra.mxu0 %v256_v1  ;;  %646 = vmatpush.msra.mxu3 %v256_v1  ;;  %v249_v8 = vld [vmem:[#allocation5 + $0x38] sm:$0xff]  ;;  %v248_v9 = vld [vmem:[#allocation5 + $0x30] sm:$0xff]  ;;  %v247_v10 = vld [vmem:[#allocation5 + $0x28] sm:$0xff]  ;;  %s873_s9 = sshra.s32 %s533_s5, 4  ;;  %s879_s22 = scalar_lea.hbm %s1168_s3, 256  ;;  %s874_s9 = int_to_ptr.hbm [resolvable:$true] %s873_s9 }
  0x35   : > { %v246_v11 = vld [vmem:[#allocation5 + $0x20] sm:$0xff]  ;;  %v245_v12 = vld [vmem:[#allocation5 + $0x18] sm:$0xff]  ;;  %v244_v13 = vld [vmem:[#allocation5 + $0x10] sm:$0xff]  ;;  %s875_s10 = scalar_lea.hbm %s874_s9, 128  ;;  %p880_p11 = scmp.lt.s32.totalorder %s874_s9, %s1168_s3 }
  0x36   : > { %264 = vmatpush.msra.mxu0 %v255_v2  ;;  %647 = vmatpush.msra.mxu3 %v255_v2  ;;  %v243_v14 = vld [vmem:[#allocation5 + $0x8] sm:$0xff]  ;;  %v242_v15 = vld [vmem:[#allocation5] sm:$0xff]  ;;  %v228_v18 = vld [vmem:[%s1067_s7 + $0x10] sm:$0xff]  ;;  %p876_p1 = scmp.ne.s32.totalorder %s874_s9, %s875_s10  ;;  %p881_p9 = scmp.lt.s32.totalorder %s879_s22, %s875_s10 }
  0x37   : > { %v226_v16 = vld [vmem:[%s1067_s7] sm:$0xff]  ;;  %v227_v17 = vld [vmem:[%s1067_s7 + $0x8] sm:$0xff]  ;;  %v229_v20 = vld [vmem:[%s1067_s7 + $0x18] sm:$0xff] }
  0x38   : > { %265 = vmatpush.msra.mxu0 %v254_v3  ;;  %648 = vmatpush.msra.mxu3 %v254_v3  ;;  %v238_v19 = vld [vmem:[%s1067_s7 + $0x60] sm:$0xff]  ;;  %v239_v21 = vld [vmem:[%s1067_s7 + $0x68] sm:$0xff]  ;;  %v240_v23 = vld [vmem:[%s1067_s7 + $0x70] sm:$0xff]  ;;  %p877_p4 = pnand %p876_p1, %p1031_p5  ;;  %p882_p2 = por %p881_p9, %p880_p11 }
  0x39   : > { %v230_v22 = vld [vmem:[%s1067_s7 + $0x20] sm:$0xff]  ;;  %v231_v24 = vld [vmem:[%s1067_s7 + $0x28] sm:$0xff]  ;;  %v241_v25 = vld [vmem:[%s1067_s7 + $0x78] sm:$0xff] }
  0x3a   : > { %266 = vmatpush.msra.mxu0 %v253_v4  ;;  %649 = vmatpush.msra.mxu3 %v253_v4  ;;  %v232_v26 = vld [vmem:[%s1067_s7 + $0x30] sm:$0xff]  ;;  %v233_v27 = vld [vmem:[%s1067_s7 + $0x38] sm:$0xff]  ;;  %v341_v30 = vld [vmem:[#allocation5 + $0xe8] sm:$0xff]  ;;  %p878_p8 = pneg %p877_p4 }
  0x3b   : > { %v343_v28 = vld [vmem:[#allocation5 + $0xf8] sm:$0xff]  ;;  %v342_v29 = vld [vmem:[#allocation5 + $0xf0] sm:$0xff]  ;;  %v340_v31 = vld [vmem:[#allocation5 + $0xe0] sm:$0xff] }
  0x3c   : > { %267 = vmatpush.msra.mxu0 %v252_v5  ;;  %650 = vmatpush.msra.mxu3 %v252_v5  ;;  %v234_v32 = vld [vmem:[%s1067_s7 + $0x40] sm:$0xff]  ;;  %v339_v33 = vld [vmem:[#allocation5 + $0xd8] sm:$0xff]  ;;  %v338_v34 = vld [vmem:[#allocation5 + $0xd0] sm:$0xff]  ;;  %p883_p10 = pnand %p882_p2, %p878_p8 }
  0x3d   : > { %349 = vmatpush.msra.mxu1 %v343_v28  ;;  %v337_v35 = vld [vmem:[#allocation5 + $0xc8] sm:$0xff]  ;;  %v336_v36 = vld [vmem:[#allocation5 + $0xc0] sm:$0xff]  ;;  %v335_v38 = vld [vmem:[#allocation5 + $0xb8] sm:$0xff] }
  0x3e   : > { %268 = vmatpush.msra.mxu0 %v251_v6  ;;  %651 = vmatpush.msra.mxu3 %v251_v6  ;;  %v235_v37 = vld [vmem:[%s1067_s7 + $0x48] sm:$0xff]  ;;  %v334_v39 = vld [vmem:[#allocation5 + $0xb0] sm:$0xff]  ;;  %v332_v41 = vld [vmem:[#allocation5 + $0xa0] sm:$0xff] }
  0x3f   : > { %350 = vmatpush.msra.mxu1 %v342_v29  ;;  %v333_v40 = vld [vmem:[#allocation5 + $0xa8] sm:$0xff]  ;;  %v236_v42 = vld [vmem:[%s1067_s7 + $0x50] sm:$0xff]  ;;  %v331_v43 = vld [vmem:[#allocation5 + $0x98] sm:$0xff] }
  0x40   : > { %269 = vmatpush.msra.mxu0 %v250_v7  ;;  %652 = vmatpush.msra.mxu3 %v250_v7  ;;  %v330_v44 = vld [vmem:[#allocation5 + $0x90] sm:$0xff]  ;;  %v237_v45 = vld [vmem:[%s1067_s7 + $0x58] sm:$0xff]  ;;  %v329_v46 = vld [vmem:[#allocation5 + $0x88] sm:$0xff] }
  0x41   : > { %351 = vmatpush.msra.mxu1 %v341_v30  ;;  %v328_v47 = vld [vmem:[#allocation5 + $0x80] sm:$0xff] }
  0x42   : > { %270 = vmatpush.msra.mxu0 %v249_v8  ;;  %653 = vmatpush.msra.mxu3 %v249_v8  ;;  %v1093_v48 = vld [vmem:[#allocation7] ss:$0 sm:$0xff] }
  0x43   : > { %352 = vmatpush.msra.mxu1 %v340_v31 }
  0x44   : > { %271 = vmatpush.msra.mxu0 %v248_v9  ;;  %654 = vmatpush.msra.mxu3 %v248_v9  ;;  %v430_v9 = vld [vmem:[#allocation5 + $0x178] sm:$0xff] }
  0x45   : > { %353 = vmatpush.msra.mxu1 %v339_v33  ;;  %436 = vmatpush.msra.mxu2 %v430_v9 }
  0x46   : > { %272 = vmatpush.msra.mxu0 %v247_v10  ;;  %655 = vmatpush.msra.mxu3 %v247_v10  ;;  %v429_v10 = vld [vmem:[#allocation5 + $0x170] sm:$0xff] }
  0x47   : > { %354 = vmatpush.msra.mxu1 %v338_v34  ;;  %437 = vmatpush.msra.mxu2 %v429_v10 }
  0x48   : > { %273 = vmatpush.msra.mxu0 %v246_v11  ;;  %656 = vmatpush.msra.mxu3 %v246_v11  ;;  %v428_v11 = vld [vmem:[#allocation5 + $0x168] sm:$0xff] }
  0x49   : > { %355 = vmatpush.msra.mxu1 %v337_v35  ;;  %438 = vmatpush.msra.mxu2 %v428_v11 }
  0x4a   : > { %274 = vmatpush.msra.mxu0 %v245_v12  ;;  %657 = vmatpush.msra.mxu3 %v245_v12  ;;  %v427_v12 = vld [vmem:[#allocation5 + $0x160] sm:$0xff] }
  0x4b   : > { %356 = vmatpush.msra.mxu1 %v336_v36  ;;  %439 = vmatpush.msra.mxu2 %v427_v12 }
  0x4c   : > { %275 = vmatpush.msra.mxu0 %v244_v13  ;;  %658 = vmatpush.msra.mxu3 %v244_v13 }
  0x4d   : > { %357 = vmatpush.msra.mxu1 %v335_v38 }
  0x4e   : > { %276 = vmatpush.msra.mxu0 %v243_v14  ;;  %659 = vmatpush.msra.mxu3 %v243_v14 }
  0x4f   : > { %358 = vmatpush.msra.mxu1 %v334_v39 }
  0x50   : > { %277 = vmatpush.msra.mxu0 %v242_v15  ;;  %660 = vmatpush.msra.mxu3 %v242_v15  ;;  %v426_v15 = vld [vmem:[#allocation5 + $0x158] sm:$0xff] }
  0x51   : > { %278 = vmatmul.f32.vlgmr.msra.gmra.mxu0 %v226_v16  ;;  %314 = vmatmul.f32.vlgmr.msra.gmra.mxu3 %v238_v19  ;;  %v425_v16 = vld [vmem:[#allocation5 + $0x150] sm:$0xff] }
  0x52   : > { %661 = vmatpush.msrb.mxu3 %v343_v28  ;;  %359 = vmatpush.msra.mxu1 %v333_v40  ;;  %v417_v28 = vld [vmem:[#allocation5 + $0x110] sm:$0xff] }
  0x53   : > { %440 = vmatpush.msra.mxu2 %v426_v15 }
  0x54   : > { %662 = vmatpush.msrb.mxu3 %v342_v29  ;;  %360 = vmatpush.msra.mxu1 %v332_v41 }
  0x55   : > { %441 = vmatpush.msra.mxu2 %v425_v16 }
  0x56   : > { %663 = vmatpush.msrb.mxu3 %v341_v30  ;;  %361 = vmatpush.msra.mxu1 %v331_v43 }
  0x58   : > { %664 = vmatpush.msrb.mxu3 %v340_v31  ;;  %362 = vmatpush.msra.mxu1 %v330_v44  ;;  %v416_v31 = vld [vmem:[#allocation5 + $0x108] sm:$0xff] }
  0x59   : > { %281 = vmatmul.f32.gmra.mxu0 %v227_v17  ;;  %317 = vmatmul.f32.gmra.mxu3 %v239_v21  ;;  %v424_v17 = vld [vmem:[#allocation5 + $0x148] sm:$0xff]  ;;  %v422_v21 = vld [vmem:[#allocation5 + $0x138] sm:$0xff] }
  0x5a   : > { %665 = vmatpush.msrb.mxu3 %v339_v33  ;;  %363 = vmatpush.msra.mxu1 %v329_v46  ;;  %v767_v33 = vld [vmem:[#allocation7 + $0x1] ss:$0 sm:$0xff] }
  0x5b   : > { %442 = vmatpush.msra.mxu2 %v424_v17 }
  0x5c   : > { %666 = vmatpush.msrb.mxu3 %v338_v34  ;;  %364 = vmatpush.msra.mxu1 %v328_v47 }
  0x5e   : > { %667 = vmatpush.msrb.mxu3 %v337_v35 }
  0x60   : > { %668 = vmatpush.msrb.mxu3 %v336_v36 }
  0x61   : > { %284 = vmatmul.f32.gmra.mxu0 %v228_v18  ;;  %320 = vmatmul.f32.gmra.mxu3 %v240_v23  ;;  %v423_v18 = vld [vmem:[#allocation5 + $0x140] sm:$0xff]  ;;  %v420_v23 = vld [vmem:[#allocation5 + $0x128] sm:$0xff] }
  0x62   : > { %669 = vmatpush.msrb.mxu3 %v335_v38  ;;  %443 = vmatpush.msra.mxu2 %v423_v18 }
  0x64   : > { %670 = vmatpush.msrb.mxu3 %v334_v39  ;;  %444 = vmatpush.msra.mxu2 %v422_v21 }
  0x66   : > { %671 = vmatpush.msrb.mxu3 %v333_v40 }
  0x68   : > { %672 = vmatpush.msrb.mxu3 %v332_v41 }
  0x69   : > { %287 = vmatmul.f32.gmra.mxu0 %v229_v20  ;;  %323 = vmatmul.f32.gmra.mxu3 %v241_v25 }
  0x6a   : > { %673 = vmatpush.msrb.mxu3 %v331_v43 }
  0x6c   : > { %674 = vmatpush.msrb.mxu3 %v330_v44 }
  0x6e   : > { %675 = vmatpush.msrb.mxu3 %v329_v46 }
  0x70   : > { %676 = vmatpush.msrb.mxu3 %v328_v47 }
  0x71   : > { %290 = vmatmul.f32.gmra.mxu0 %v230_v22  ;;  %v421_v22 = vld [vmem:[#allocation5 + $0x130] sm:$0xff] }
  0x72   : > { %677 = vmatpush.msra.mxu3 %v430_v9  ;;  %445 = vmatpush.msra.mxu2 %v421_v22 }
  0x74   : > { %678 = vmatpush.msra.mxu3 %v429_v10  ;;  %446 = vmatpush.msra.mxu2 %v420_v23 }
  0x76   : > { %679 = vmatpush.msra.mxu3 %v428_v11 }
  0x78   : > { %680 = vmatpush.msra.mxu3 %v427_v12 }
  0x79   : > { %293 = vmatmul.f32.gmra.mxu0 %v231_v24  ;;  %v419_v24 = vld [vmem:[#allocation5 + $0x120] sm:$0xff] }
  0x7a   : > { %681 = vmatpush.msra.mxu3 %v426_v15  ;;  %447 = vmatpush.msra.mxu2 %v419_v24 }
  0x7c   : > { %682 = vmatpush.msra.mxu3 %v425_v16 }
  0x7e   : > { %683 = vmatpush.msra.mxu3 %v424_v17 }
  0x80   : > { %684 = vmatpush.msra.mxu3 %v423_v18 }
  0x81   : > { %296 = vmatmul.f32.gmra.mxu0 %v232_v26 }
  0x82   : > { %685 = vmatpush.msra.mxu3 %v422_v21 }
  0x84   : > { %686 = vmatpush.msra.mxu3 %v421_v22 }
  0x86   : > { %687 = vmatpush.msra.mxu3 %v420_v23 }
  0x88   : > { %688 = vmatpush.msra.mxu3 %v419_v24 }
  0x89   : > { %299 = vmatmul.f32.gmra.mxu0 %v233_v27  ;;  %v418_v27 = vld [vmem:[#allocation5 + $0x118] sm:$0xff] }
  0x8a   : > { %448 = vmatpush.msra.mxu2 %v418_v27  ;;  %689 = vmatpush.msra.mxu3 %v418_v27 }
  0x8c   : > { %449 = vmatpush.msra.mxu2 %v417_v28  ;;  %690 = vmatpush.msra.mxu3 %v417_v28 }
  0x8e   : > { %450 = vmatpush.msra.mxu2 %v416_v31  ;;  %691 = vmatpush.msra.mxu3 %v416_v31 }
  0x91   : > { %302 = vmatmul.f32.gmra.mxu0 %v234_v32  ;;  %v415_v32 = vld [vmem:[#allocation5 + $0x100] sm:$0xff] }
  0x92   : > { %451 = vmatpush.msra.mxu2 %v415_v32  ;;  %692 = vmatpush.msra.mxu3 %v415_v32 }
  0x99   : > { %305 = vmatmul.f32.gmra.mxu0 %v235_v37 }
  0xa1   : > { %308 = vmatmul.f32.gmra.mxu0 %v236_v42 }
  0xa9   : > { %311 = vmatmul.f32.gmra.mxu0 %v237_v45 }
  0xce   : > { %v279_v49 = vpop.f32.mrf.mxu0 }
  0xcf   : > { %v280_v50 = vadd.f32 %v1093_v48, %v279_v49 }
  0xd1   : > { %365 = vmatmul.f32.vlgmr.msra.gmra.mxu1 %v280_v50 }
  0xd4   : > { %v315_v57 = vpop.f32.mrf.mxu3 }
  0xd5   : > { %v316_v58 = vadd.f32 %v1093_v48, %v315_v57 }
  0xd6   : > { %v282_v51 = vpop.f32.mrf.mxu0 }
  0xd7   : > { %v283_v52 = vadd.f32 %v1093_v48, %v282_v51  ;;  %401 = vmatmul.f32.vlgmr.msrb.gmra.mxu3 %v316_v58 }
  0xd9   : > { %368 = vmatmul.f32.gmra.mxu1 %v283_v52 }
  0xdc   : > { %v318_v61 = vpop.f32.mrf.mxu3 }
  0xdd   : > { %v319_v62 = vadd.f32 %v1093_v48, %v318_v61 }
  0xde   : > { %v285_v53 = vpop.f32.mrf.mxu0 }
  0xdf   : > { %v286_v54 = vadd.f32 %v1093_v48, %v285_v53  ;;  %404 = vmatmul.f32.gmra.mxu3 %v319_v62 }
  0xe1   : > { %371 = vmatmul.f32.gmra.mxu1 %v286_v54 }
  0xe4   : > { %v321_v1 = vpop.f32.mrf.mxu3 }
  0xe5   : > { %v322_v2 = vadd.f32 %v1093_v48, %v321_v1 }
  0xe6   : > { %v288_v55 = vpop.f32.mrf.mxu0 }
  0xe7   : > { %v289_v56 = vadd.f32 %v1093_v48, %v288_v55  ;;  %407 = vmatmul.f32.gmra.mxu3 %v322_v2  ;;  %v768_v2 = vld [vmem:[#allocation7 + $0x2] ss:$0 sm:$0xff] }
  0xe9   : > { %374 = vmatmul.f32.gmra.mxu1 %v289_v56 }
  0xec   : > { %v324_v5 = vpop.f32.mrf.mxu3 }
  0xed   : > { %v325_v6 = vadd.f32 %v1093_v48, %v324_v5 }
  0xee   : > { %v291_v59 = vpop.f32.mrf.mxu0 }
  0xef   : > { %v292_v60 = vadd.f32 %v1093_v48, %v291_v59  ;;  %410 = vmatmul.f32.gmra.mxu3 %v325_v6 }
  0xf1   : > { %377 = vmatmul.f32.gmra.mxu1 %v292_v60 }
  0xf6   : > { %v294_v63 = vpop.f32.mrf.mxu0 }
  0xf7   : > { %v295_v0 = vadd.f32 %v1093_v48, %v294_v63 }
  0xf9   : > { %380 = vmatmul.f32.gmra.mxu1 %v295_v0 }
  0xfe   : > { %v297_v3 = vpop.f32.mrf.mxu0 }
  0xff   : > { %v298_v4 = vadd.f32 %v1093_v48, %v297_v3 }
 0x101   : > { %383 = vmatmul.f32.gmra.mxu1 %v298_v4 }
 0x106   : > { %v300_v7 = vpop.f32.mrf.mxu0 }
 0x107   : > { %v301_v8 = vadd.f32 %v1093_v48, %v300_v7 }
 0x109   : > { %386 = vmatmul.f32.gmra.mxu1 %v301_v8 }
 0x10e   : > { %v303_v13 = vpop.f32.mrf.mxu0 }
 0x10f   : > { %v304_v14 = vadd.f32 %v1093_v48, %v303_v13 }
 0x111   : > { %389 = vmatmul.f32.gmra.mxu1 %v304_v14 }
 0x116   : > { %v306_v19 = vpop.f32.mrf.mxu0 }
 0x117   : > { %v307_v20 = vadd.f32 %v1093_v48, %v306_v19 }
 0x119   : > { %392 = vmatmul.f32.gmra.mxu1 %v307_v20 }
 0x11e   : > { %v309_v25 = vpop.f32.mrf.mxu0 }
 0x11f   : > { %v310_v26 = vadd.f32 %v1093_v48, %v309_v25 }
 0x121   : > { %395 = vmatmul.f32.gmra.mxu1 %v310_v26 }
 0x126   : > { %v312_v29 = vpop.f32.mrf.mxu0 }
 0x127   : > { %v313_v30 = vadd.f32 %v1093_v48, %v312_v29 }
 0x129   : > { %398 = vmatmul.f32.gmra.mxu1 %v313_v30 }
 0x14e   : > { %v366_v34 = vpop.f32.mrf.mxu1 }
 0x14f   : > { %v367_v35 = vadd.f32 %v767_v33, %v366_v34 }
 0x151   : > { %452 = vmatmul.f32.vlgmr.msra.gmra.mxu2 %v367_v35 }
 0x156   : > { %v369_v36 = vpop.f32.mrf.mxu1 }
 0x157   : > { %v370_v37 = vadd.f32 %v767_v33, %v369_v36 }
 0x159   : > { %455 = vmatmul.f32.gmra.mxu2 %v370_v37 }
 0x15a   : > { %v402_v43 = vpop.f32.mrf.mxu3 }
 0x15b   : > { %v403_v45 = vadd.f32 %v767_v33, %v402_v43 }
 0x15d   : > { %488 = vmatmul.f32.vlgmr.msra.gmra.mxu3 %v403_v45 }
 0x15e   : > { %v372_v38 = vpop.f32.mrf.mxu1 }
 0x15f   : > { %v373_v39 = vadd.f32 %v767_v33, %v372_v38 }
 0x161   : > { %458 = vmatmul.f32.gmra.mxu2 %v373_v39 }
 0x162   : > { %v405_v47 = vpop.f32.mrf.mxu3 }
 0x163   : > { %v406_v49 = vadd.f32 %v767_v33, %v405_v47 }
 0x165   : > { %491 = vmatmul.f32.gmra.mxu3 %v406_v49 }
 0x166   : > { %v375_v40 = vpop.f32.mrf.mxu1 }
 0x167   : > { %v376_v41 = vadd.f32 %v767_v33, %v375_v40 }
 0x169   : > { %461 = vmatmul.f32.gmra.mxu2 %v376_v41 }
 0x16a   : > { %v408_v51 = vpop.f32.mrf.mxu3 }
 0x16b   : > { %v409_v53 = vadd.f32 %v767_v33, %v408_v51 }
 0x16d   : > { %494 = vmatmul.f32.gmra.mxu3 %v409_v53 }
 0x16e   : > { %v378_v42 = vpop.f32.mrf.mxu1 }
 0x16f   : > { %v379_v44 = vadd.f32 %v767_v33, %v378_v42 }
 0x171   : > { %464 = vmatmul.f32.gmra.mxu2 %v379_v44 }
 0x172   : > { %v411_v55 = vpop.f32.mrf.mxu3 }
 0x173   : > { %v412_v57 = vadd.f32 %v767_v33, %v411_v55 }
 0x175   : > { %497 = vmatmul.f32.gmra.mxu3 %v412_v57 }
 0x176   : > { %v381_v46 = vpop.f32.mrf.mxu1 }
 0x177   : > { %v382_v48 = vadd.f32 %v767_v33, %v381_v46 }
 0x179   : > { %467 = vmatmul.f32.gmra.mxu2 %v382_v48 }
 0x17e   : > { %v384_v50 = vpop.f32.mrf.mxu1 }
 0x17f   : > { %v385_v52 = vadd.f32 %v767_v33, %v384_v50 }
 0x181   : > { %470 = vmatmul.f32.gmra.mxu2 %v385_v52 }
 0x186   : > { %v387_v54 = vpop.f32.mrf.mxu1 }
 0x187   : > { %v388_v56 = vadd.f32 %v767_v33, %v387_v54 }
 0x189   : > { %473 = vmatmul.f32.gmra.mxu2 %v388_v56 }
 0x18e   : > { %v390_v58 = vpop.f32.mrf.mxu1 }
 0x18f   : > { %v391_v59 = vadd.f32 %v767_v33, %v390_v58 }
 0x191   : > { %476 = vmatmul.f32.gmra.mxu2 %v391_v59 }
 0x196   : > { %v393_v60 = vpop.f32.mrf.mxu1 }
 0x197   : > { %v394_v61 = vadd.f32 %v767_v33, %v393_v60 }
 0x199   : > { %479 = vmatmul.f32.gmra.mxu2 %v394_v61 }
 0x19e   : > { %v396_v62 = vpop.f32.mrf.mxu1 }
 0x19f   : > { %v397_v63 = vadd.f32 %v767_v33, %v396_v62 }
 0x1a1   : > { %482 = vmatmul.f32.gmra.mxu2 %v397_v63 }
 0x1a6   : > { %v399_v0 = vpop.f32.mrf.mxu1 }
 0x1a7   : > { %v400_v1 = vadd.f32 %v767_v33, %v399_v0 }
 0x1a9   : > { %485 = vmatmul.f32.gmra.mxu2 %v400_v1 }
 0x1d4   : > { %v453_v3 = vpop.f32.mrf.mxu2 }
 0x1d5   : > { %v454_v4 = vadd.f32 %v768_v2, %v453_v3 }
 0x1d7   : > { %501 = vst [vmem:[%s1113_s18] sm:$0xff] %v454_v4 }
 0x1dc   : > { %v456_v5 = vpop.f32.mrf.mxu2 }
 0x1dd   : > { %v457_v6 = vadd.f32 %v768_v2, %v456_v5 }
 0x1df   : > { %502 = vst [vmem:[%s1113_s18 + $0x8] sm:$0xff] %v457_v6 }
 0x1e0   : > { %v489_v12 = vpop.f32.mrf.mxu3 }
 0x1e1   : > { %v490_v14 = vadd.f32 %v768_v2, %v489_v12 }
 0x1e3   : > { %513 = vst [vmem:[%s1113_s18 + $0x60] sm:$0xff] %v490_v14 }
 0x1e4   : > { %v459_v7 = vpop.f32.mrf.mxu2 }
 0x1e5   : > { %v460_v8 = vadd.f32 %v768_v2, %v459_v7 }
 0x1e7   : > { %503 = vst [vmem:[%s1113_s18 + $0x10] sm:$0xff] %v460_v8 }
 0x1e8   : > { %v492_v16 = vpop.f32.mrf.mxu3 }
 0x1e9   : > { %v493_v18 = vadd.f32 %v768_v2, %v492_v16 }
 0x1eb   : > { %514 = vst [vmem:[%s1113_s18 + $0x68] sm:$0xff] %v493_v18 }
 0x1ec   : > { %v462_v9 = vpop.f32.mrf.mxu2 }
 0x1ed   : > { %v463_v10 = vadd.f32 %v768_v2, %v462_v9 }
 0x1ef   : > { %504 = vst [vmem:[%s1113_s18 + $0x18] sm:$0xff] %v463_v10 }
 0x1f0   : > { %v495_v20 = vpop.f32.mrf.mxu3 }
 0x1f1   : > { %v496_v22 = vadd.f32 %v768_v2, %v495_v20 }
 0x1f3   : > { %515 = vst [vmem:[%s1113_s18 + $0x70] sm:$0xff] %v496_v22 }
 0x1f4   : > { %v465_v11 = vpop.f32.mrf.mxu2 }
 0x1f5   : > { %v466_v13 = vadd.f32 %v768_v2, %v465_v11 }
 0x1f7   : > { %505 = vst [vmem:[%s1113_s18 + $0x20] sm:$0xff] %v466_v13 }
 0x1f8   : > { %v498_v24 = vpop.f32.mrf.mxu3 }
 0x1f9   : > { %v499_v26 = vadd.f32 %v768_v2, %v498_v24 }
 0x1fb   : > { %516 = vst [vmem:[%s1113_s18 + $0x78] sm:$0xff] %v499_v26 }
 0x1fc   : > { %v468_v15 = vpop.f32.mrf.mxu2 }
 0x1fd   : > { %v469_v17 = vadd.f32 %v768_v2, %v468_v15 }
 0x1ff   : > { %506 = vst [vmem:[%s1113_s18 + $0x28] sm:$0xff] %v469_v17 }
 0x204   : > { %v471_v19 = vpop.f32.mrf.mxu2 }
 0x205   : > { %v472_v21 = vadd.f32 %v768_v2, %v471_v19 }
 0x207   : > { %507 = vst [vmem:[%s1113_s18 + $0x30] sm:$0xff] %v472_v21 }
 0x20c   : > { %v474_v23 = vpop.f32.mrf.mxu2 }
 0x20d   : > { %v475_v25 = vadd.f32 %v768_v2, %v474_v23 }
 0x20f   : > { %508 = vst [vmem:[%s1113_s18 + $0x38] sm:$0xff] %v475_v25 }
 0x214   : > { %v477_v27 = vpop.f32.mrf.mxu2 }
 0x215   : > { %v478_v28 = vadd.f32 %v768_v2, %v477_v27 }
 0x217   : > { %509 = vst [vmem:[%s1113_s18 + $0x40] sm:$0xff] %v478_v28 }
 0x21c   : > { %v480_v29 = vpop.f32.mrf.mxu2 }
 0x21d   : > { %v481_v30 = vadd.f32 %v768_v2, %v480_v29 }
 0x21f   : > { %510 = vst [vmem:[%s1113_s18 + $0x48] sm:$0xff] %v481_v30 }
 0x224   : > { %v483_v31 = vpop.f32.mrf.mxu2 }
 0x225   : > { %v484_v32 = vadd.f32 %v768_v2, %v483_v31 }
 0x227   : > { %511 = vst [vmem:[%s1113_s18 + $0x50] sm:$0xff] %v484_v32 }
 0x22c   : > { %v486_v33 = vpop.f32.mrf.mxu2 }
 0x22d   : > { %v487_v34 = vadd.f32 %v768_v2, %v486_v33 }
 0x22f   : > { %512 = vst [vmem:[%s1113_s18 + $0x58] sm:$0xff] %v487_v34 }
 0x230   : > { %886 = shalt.err (!%p883_p10)
}
 0x231   : > { %s937_s20 = smov 128   ;;  %s938_s26 = smov 8  }
 0x232   : > { %703 = dma.vmem_to_hbm [thread:$0]  (%p1031_p5), %s531_s4, 2048, %s533_s5, %s518_s6, %s937_s20, %s937_s20, %s938_s26  }
 0x233 PF: > { %s547_s27 = sand.u32 1, %s917_s12   ;;  %p1174_p12 = scmp.ge.s32.totalorder %s929_s15, 2 }
 0x234   : > { %s548_s7 = scalar_lea.sflag [#allocation4], %s547_s27 }
 0x235   : > { %p717_p13 = pnand %p1174_p12, %p994_p6 }
 0x237   : > { %p718_p0 = pneg %p717_p13 }
 0x239   : > { %912 = dma.done.wait (%p718_p0), %s548_s7, 2048  }
 0x23a   : > { %914 = vsyncadd (%p718_p0), %s548_s7, 4294965248  ;;  %p17_p3 = scmp.ge.s32.totalorder %s1018_s8, 4   ;;  %s1175_s12 = smov %s921_s13 }
 0x23b   : > { %s1176_s13 = smov %s925_s14  ;;  %s1177_s14 = smov %s1027_s11 }
 0x23c   : > { %s1178_s15 = smov %s1018_s8  ;;  %19 = sbr.rel (!%p17_p3) target bundleno = 6 (0x6), region = 89 }
 0x241   :  { %554 = vsyncpa [#allocation3], 1 }
 0x242   :  { %556 = vsyncpa [#allocation3 + $0x1], 1 }
 0x243   :  { %557 = vsyncpa [#allocation6], 1 }
 0x244   :  { %558 = vsyncpa [#allocation4], 1 }
 0x245   :  { %560 = vsyncpa [#allocation4 + $0x1], 1 }

</bundles_post_ra>
